<compile_context>
chip_gen: v7x
topology: tpu7x:2x2x1
jax: 0.10.0
libtpu: 0.0.40
codegen_flags: <defaults>
</compile_context>

<pallas_src>
import jax
import jax.numpy as jnp
from jax import lax
from jax.experimental import pallas as pl
from jax.experimental.pallas import tpu as pltpu

KERNEL_SIZE = 3
DILATION = 2
PADDING = 2
BN_EPS = 1e-5
_VMEM_BLOCK_BUDGET = 6 * 1024 * 1024  # per-step working-set target (incl. 2x buffers)


def _pick_lane_tile(total, quantum, bytes_per_lane, target=1024):
    """Largest lane tile that is a multiple of `quantum`, divides `total`, and is
    either == total or a multiple of 128 (satisfies the (8,128) block rule and
    keeps stores unmasked), whose footprint fits the VMEM budget. Stops growing
    once >= `target` lanes while >= 2 grid steps remain (megacore balance)."""
    cands = [t for t in range(quantum, total + 1, quantum)
             if total % t == 0 and (t == total or t % 128 == 0)]
    best = cands[0]
    for t in cands[1:]:
        if t * bytes_per_lane > _VMEM_BLOCK_BUDGET:
            break
        best = t
        if t >= target and total // t >= 2:
            break
    return best


def _make_conv_stats_kernel(L):
    def kernel(x_ref, w_ref, y_ref, stat_ref):
        # x_ref: (C_in_pad, B*L) f32      w_ref: (C_out, K*C_in_pad) bf16
        # y_ref: (C_out, B*L) bf16        stat_ref: (1, C_out, 2) f32 [sum, centered SSQ]
        C_in_p, BL = x_ref.shape
        x = x_ref[...]
        # within-sample position for each lane (lane = b*L + l)
        pos = lax.broadcasted_iota(jnp.int32, (C_in_p, BL), 1) % L

        taps = []
        for t in range(KERNEL_SIZE):
            off = t * DILATION - PADDING                     # -2, 0, +2
            if off == 0:
                taps.append(x)
            else:
                # tap[b, l] = x[b, l + off], zero outside [0, L): circular lane
                # roll on the XLU + per-sample lane mask (mask also kills the
                # values the roll drags across sample boundaries).
                rolled = pltpu.roll(x, shift=(-off) % BL, axis=1)
                lo = max(0, -off)
                hi = min(L, L - off)
                taps.append(jnp.where((pos >= lo) & (pos < hi), rolled, 0.0))

        # im2col tile; row order t*C_in_pad + c matches the wrapper weight reshape.
        # (taps kept f32 -> single cast; safe on v5e which lacks a bf16 VPU.)
        xcol = jnp.concatenate(taps, axis=0).astype(jnp.bfloat16)   # (K*C_in_p, B*L)

        # Single MXU contraction, f32 accumulation, lane dim = B*L.
        acc = jnp.dot(w_ref[...], xcol, preferred_element_type=jnp.float32)  # (C_out, B*L)

        y_ref[...] = acc.astype(y_ref.dtype)                 # bf16 intermediate

        # f32 per-block BN partials: sum and block-mean-centered sum of squares
        # (numerically stable parallel-variance combine happens in the wrapper).
        s = jnp.sum(acc, axis=1, keepdims=True)              # (C_out, 1)
        d = acc - s * (1.0 / BL)
        m2 = jnp.sum(d * d, axis=1, keepdims=True)           # (C_out, 1)
        stat_ref[...] = jnp.concatenate([s, m2], axis=1)[None]
    return kernel


def _bn_relu_kernel(y_ref, scale_ref, shift_ref, o_ref):
    # y_ref: (C_out, T) bf16;  scale/shift: (C_out, 1) f32;  o_ref: (C_out, T) f32
    y = y_ref[...].astype(jnp.float32)
    o_ref[...] = jnp.maximum(y * scale_ref[...] + shift_ref[...], 0.0)


def tdnn_forward(x, weight, bias, gamma, beta):
    """x: (N, C_in, L) f32; weight: (C_out, C_in, K); bias/gamma/beta: (C_out,)."""
    del bias  # exactly cancelled by train-mode BatchNorm mean subtraction
    N, C_in, L = x.shape
    C_out, _, K = weight.shape

    # Pad channels to a sublane multiple of 8 (tile-aligned in-kernel im2col
    # concat); zero channels x zero weight rows contribute nothing.
    C_in_p = -(-C_in // 8) * 8
    pad_c = C_in_p - C_in
    x_p = jnp.pad(x, ((0, 0), (0, pad_c), (0, 0))) if pad_c else x
    w_p = jnp.pad(weight, ((0, 0), (0, pad_c), (0, 0))) if pad_c else weight

    # Channels-major lane-dense layouts (wrapper-side layout plumbing).
    x_flat = jnp.transpose(x_p, (1, 0, 2)).reshape(C_in_p, N * L)              # f32
    w2 = jnp.transpose(w_p, (0, 2, 1)).reshape(C_out, K * C_in_p).astype(jnp.bfloat16)

    cparams = pltpu.CompilerParams(
        dimension_semantics=("parallel",),
        vmem_limit_bytes=32 * 1024 * 1024,   # leaves headroom even on v7x (64 MiB VMEM)
    )

    # ---- pass 1: dilated conv (one MXU matmul / step) + per-block BN partials ----
    bytes1 = 4 * (2 * C_in_p + KERNEL_SIZE * C_in_p + 3 * C_out)   # rough bytes / lane
    tile1 = _pick_lane_tile(N * L, L, bytes1)                      # = B*L
    n_blk = (N * L) // tile1

    y_flat, stats = pl.pallas_call(
        _make_conv_stats_kernel(L),
        grid=(n_blk,),
        in_specs=[
            pl.BlockSpec((C_in_p, tile1), lambda i: (0, i)),
            pl.BlockSpec((C_out, KERNEL_SIZE * C_in_p), lambda i: (0, 0)),
        ],
        out_specs=(
            pl.BlockSpec((C_out, tile1), lambda i: (0, i)),
            pl.BlockSpec((1, C_out, 2), lambda i: (i, 0, 0)),
        ),
        out_shape=(
            jax.ShapeDtypeStruct((C_out, N * L), jnp.bfloat16),
            jax.ShapeDtypeStruct((n_blk, C_out, 2), jnp.float32),
        ),
        compiler_params=cparams,
    )(x_flat, w2)

    # ---- glue: parallel-variance combine -> folded BN scale/shift ----------------
    cnt = float(tile1)
    total = float(N * L)
    sums = stats[..., 0]                                    # (n_blk, C_out)
    m2s = stats[..., 1]
    mean = jnp.sum(sums, axis=0) / total                    # (C_out,)
    means_b = sums / cnt
    m2 = jnp.sum(m2s, axis=0) + cnt * jnp.sum(jnp.square(means_b - mean[None, :]), axis=0)
    var = m2 / total                                        # biased var, as in BN forward
    g = gamma.astype(jnp.float32)
    inv = lax.rsqrt(var + BN_EPS)
    scale = (g * inv).reshape(C_out, 1)
    shift = (beta.astype(jnp.float32) - mean * g * inv).reshape(C_out, 1)

    # ---- pass 2: folded BN + ReLU over big lane-dense tiles ----------------------
    bytes2 = 12 * C_out                                     # bf16 in + f32 out, x2 buffers
    tile2 = _pick_lane_tile(N * L, 1, bytes2, target=2048)
    out_flat = pl.pallas_call(
        _bn_relu_kernel,
        grid=((N * L) // tile2,),
        in_specs=[
            pl.BlockSpec((C_out, tile2), lambda i: (0, i)),
            pl.BlockSpec((C_out, 1), lambda i: (0, 0)),
            pl.BlockSpec((C_out, 1), lambda i: (0, 0)),
        ],
        out_specs=pl.BlockSpec((C_out, tile2), lambda i: (0, i)),
        out_shape=jax.ShapeDtypeStruct((C_out, N * L), jnp.float32),
        compiler_params=cparams,
    )(y_flat, scale, shift)

    # Back to the module's (N, C_out, L) layout.
    return jnp.transpose(out_flat.reshape(C_out, N, L), (1, 0, 2))


def _reference(x, weight, bias, gamma, beta):
    """Pure-JAX reference (bf16-valued conv inputs to mirror MXU precision)."""
    N, C_in, L = x.shape
    C_out = weight.shape[0]
    xb = x.astype(jnp.bfloat16).astype(jnp.float32)
    wb = weight.astype(jnp.bfloat16).astype(jnp.float32)
    xpad = jnp.pad(xb, ((0, 0), (0, 0), (PADDING, PADDING)))
    conv = jnp.zeros((N, C_out, L), jnp.float32)
    for t in range(KERNEL_SIZE):
        xs = xpad[:, :, t * DILATION: t * DILATION + L]
        conv = conv + jnp.einsum("oc,ncl->nol", wb[:, :, t], xs,
                                 preferred_element_type=jnp.float32)
    conv = conv + bias.reshape(1, C_out, 1)
    mean = jnp.mean(conv, axis=(0, 2), keepdims=True)
    var = jnp.var(conv, axis=(0, 2), keepdims=True)          # biased, as in BN forward
    y = (conv - mean) * lax.rsqrt(var + BN_EPS)
    y = gamma.reshape(1, C_out, 1) * y + beta.reshape(1, C_out, 1)
    return jnp.maximum(y, 0.0)


if __name__ == "__main__":
    # small shapes consistent with the module
    N, C_in, C_out, L = 2, 4, 8, 16

    key = jax.random.PRNGKey(0)
    kx, kw, kb = jax.random.split(key, 3)

    x = jax.random.normal(kx, (N, C_in, L), dtype=jnp.float32)

    # deterministic parameter init (PyTorch-like uniform bound for Conv1d)
    fan_in = C_in * KERNEL_SIZE
    bound = 1.0 / (fan_in ** 0.5)
    weight = jax.random.uniform(kw, (C_out, C_in, KERNEL_SIZE),
                                minval=-bound, maxval=bound, dtype=jnp.float32)
    bias = jax.random.uniform(kb, (C_out,), minval=-bound, maxval=bound,
                              dtype=jnp.float32)
    gamma = jnp.ones((C_out,), dtype=jnp.float32)   # BN weight
    beta = jnp.zeros((C_out,), dtype=jnp.float32)   # BN bias

    out = tdnn_forward(x, weight, bias, gamma, beta)
    jax.block_until_ready(out)
    assert out.shape == (N, C_out, L)

    ref = _reference(x, weight, bias, gamma, beta)
    # tolerance covers the bf16 conv-intermediate quantization (<=0.2% relative)
    assert bool(jnp.allclose(out, ref, atol=1e-2, rtol=1e-2)), "mismatch vs reference"

    print("KERNEL_OK")
</pallas_src>

<mosaic_0001>
module attributes {stable_mosaic.version = 11 : i64} {
  func.func @kernel(%arg0: i32, %arg1: memref<8x32xf32, #tpu.memory_space<vmem>>, %arg2: memref<8x24xbf16, #tpu.memory_space<vmem>>, %arg3: memref<8x32xbf16, #tpu.memory_space<vmem>>, %arg4: memref<1x8x2xf32, #tpu.memory_space<vmem>>) attributes {dimension_semantics = [#tpu.dimension_semantics<parallel>], iteration_bounds = array<i64: 1>, scalar_prefetch = 0 : i64, scratch_operands = 0 : i64, tpu.core_type = #tpu.core_type<tc>, window_params = [{transform_indices = @transform_0, window_bounds = array<i64: 8, 32>}, {pipeline_mode = #tpu.pipeline_mode<synchronous>, transform_indices = @transform_1, window_bounds = array<i64: 8, 24>}, {transform_indices = @transform_2, window_bounds = array<i64: 8, 32>}, {transform_indices = @transform_3, window_bounds = array<i64: 1, 8, 2>}]} {
    %c0 = arith.constant 0 : index
    %c0_0 = arith.constant 0 : index
    %0 = vector.load %arg1[%c0, %c0_0] : memref<8x32xf32, #tpu.memory_space<vmem>>, vector<8x32xf32>
    %1 = tpu.iota {dimensions = array<i32: 1>} : vector<8x32xi32>
    %c16_i32 = arith.constant 16 : i32
    %c0_i32 = arith.constant 0 : i32
    %2 = arith.cmpi eq, %c16_i32, %c0_i32 : i32
    %c1_i32 = arith.constant 1 : i32
    %3 = arith.select %2, %c1_i32, %c16_i32 : i32
    %4 = vector.broadcast %3 : i32 to vector<8x32xi32>
    %5 = arith.remsi %1, %4 : vector<8x32xi32>
    %c0_i32_1 = arith.constant 0 : i32
    %6 = vector.broadcast %c0_i32_1 : i32 to vector<8x32xi32>
    %7 = arith.cmpi ne, %5, %6 : vector<8x32xi32>
    %c0_i32_2 = arith.constant 0 : i32
    %8 = vector.broadcast %c0_i32_2 : i32 to vector<8x32xi32>
    %9 = arith.cmpi slt, %5, %8 : vector<8x32xi32>
    %c0_i32_3 = arith.constant 0 : i32
    %10 = arith.cmpi slt, %3, %c0_i32_3 : i32
    %11 = vector.broadcast %10 : i1 to vector<8x32xi1>
    %12 = vector.broadcast %11 : vector<8x32xi1> to vector<8x32xi1>
    %13 = arith.xori %9, %12 : vector<8x32xi1>
    %14 = arith.andi %13, %7 : vector<8x32xi1>
    %15 = vector.broadcast %3 : i32 to vector<8x32xi32>
    %16 = arith.addi %5, %15 : vector<8x32xi32>
    %17 = arith.select %14, %16, %5 : vector<8x32xi1>, vector<8x32xi32>
    %c2_i32 = arith.constant 2 : i32
    %18 = tpu.dynamic_rotate %0 by %c2_i32 dim 1 : vector<8x32xf32>, i32 -> vector<8x32xf32>
    %c2_i32_4 = arith.constant 2 : i32
    %19 = vector.broadcast %c2_i32_4 : i32 to vector<8x32xi32>
    %20 = arith.cmpi sge, %17, %19 : vector<8x32xi32>
    %c16_i32_5 = arith.constant 16 : i32
    %21 = vector.broadcast %c16_i32_5 : i32 to vector<8x32xi32>
    %22 = arith.cmpi slt, %17, %21 : vector<8x32xi32>
    %23 = arith.andi %20, %22 : vector<8x32xi1>
    %cst = arith.constant 0.000000e+00 : f32
    %24 = vector.broadcast %cst : f32 to vector<8x32xf32>
    %25 = arith.select %23, %18, %24 : vector<8x32xi1>, vector<8x32xf32>
    %c30_i32 = arith.constant 30 : i32
    %26 = tpu.dynamic_rotate %0 by %c30_i32 dim 1 : vector<8x32xf32>, i32 -> vector<8x32xf32>
    %c0_i32_6 = arith.constant 0 : i32
    %27 = vector.broadcast %c0_i32_6 : i32 to vector<8x32xi32>
    %28 = arith.cmpi sge, %17, %27 : vector<8x32xi32>
    %c14_i32 = arith.constant 14 : i32
    %29 = vector.broadcast %c14_i32 : i32 to vector<8x32xi32>
    %30 = arith.cmpi slt, %17, %29 : vector<8x32xi32>
    %31 = arith.andi %28, %30 : vector<8x32xi1>
    %cst_7 = arith.constant 0.000000e+00 : f32
    %32 = vector.broadcast %cst_7 : f32 to vector<8x32xf32>
    %33 = arith.select %31, %26, %32 : vector<8x32xi1>, vector<8x32xf32>
    %34 = tpu.concatenate %25, %0, %33 in 0 : vector<8x32xf32>, vector<8x32xf32>, vector<8x32xf32> -> vector<24x32xf32>
    %35 = arith.truncf %34 : vector<24x32xf32> to vector<24x32xbf16>
    %c0_8 = arith.constant 0 : index
    %c0_9 = arith.constant 0 : index
    %36 = vector.load %arg2[%c0_8, %c0_9] : memref<8x24xbf16, #tpu.memory_space<vmem>>, vector<8x24xbf16>
    %cst_10 = arith.constant dense<0.000000e+00> : vector<8x32xf32>
    %37 = tpu.matmul %36, %35, %cst_10 {dimension_numbers = #tpu.dot_dimension_numbers<[1], [0], [0], [1], [0, 0, 1, 1], [], []>} : vector<8x24xbf16>, vector<24x32xbf16>, vector<8x32xf32> -> vector<8x32xf32>
    %38 = arith.truncf %37 : vector<8x32xf32> to vector<8x32xbf16>
    %c0_11 = arith.constant 0 : index
    %c0_12 = arith.constant 0 : index
    %39 = vector.load %arg3[%c0_11, %c0_12] : memref<8x32xbf16, #tpu.memory_space<vmem>>, vector<8x32xbf16>
    tpu.vector_store %arg3[%c0_11, %c0_12], %38 {strides = array<i32>} : memref<8x32xbf16, #tpu.memory_space<vmem>>, vector<8x32xbf16>,
    %cst_13 = arith.constant dense<0.000000e+00> : vector<8xf32>
    %40 = vector.multi_reduction <add>, %37, %cst_13 [1] : vector<8x32xf32> to vector<8xf32>
    %41 = vector.shape_cast %40 : vector<8xf32> to vector<8x1xf32>
    %cst_14 = arith.constant 3.125000e-02 : f32
    %42 = vector.broadcast %cst_14 : f32 to vector<8x1xf32>
    %43 = arith.mulf %41, %42 : vector<8x1xf32>
    %44 = vector.broadcast %43 : vector<8x1xf32> to vector<8x32xf32>
    %45 = arith.subf %37, %44 : vector<8x32xf32>
    %46 = arith.mulf %45, %45 : vector<8x32xf32>
    %cst_15 = arith.constant dense<0.000000e+00> : vector<8xf32>
    %47 = vector.multi_reduction <add>, %46, %cst_15 [1] : vector<8x32xf32> to vector<8xf32>
    %48 = vector.shape_cast %47 : vector<8xf32> to vector<8x1xf32>
    %49 = tpu.concatenate %41, %48 in 1 : vector<8x1xf32>, vector<8x1xf32> -> vector<8x2xf32>
    %50 = vector.shape_cast %49 : vector<8x2xf32> to vector<1x8x2xf32>
    %c0_16 = arith.constant 0 : index
    %c0_17 = arith.constant 0 : index
    %c0_18 = arith.constant 0 : index
    %51 = vector.load %arg4[%c0_16, %c0_17, %c0_18] : memref<1x8x2xf32, #tpu.memory_space<vmem>>, vector<1x8x2xf32>
    tpu.vector_store %arg4[%c0_16, %c0_17, %c0_18], %50 {strides = array<i32>} : memref<1x8x2xf32, #tpu.memory_space<vmem>>, vector<1x8x2xf32>,
    return
  }
  func.func @transform_0(%arg0: i32) -> (i32, i32) {
    %c0_i32 = arith.constant 0 : i32
    %c0_i32_0 = arith.constant 0 : i32
    return %c0_i32, %arg0 : i32, i32
  }
  func.func @transform_1(%arg0: i32) -> (i32, i32) {
    %c0_i32 = arith.constant 0 : i32
    %c0_i32_0 = arith.constant 0 : i32
    %c0_i32_1 = arith.constant 0 : i32
    return %c0_i32, %c0_i32_0 : i32, i32
  }
  func.func @transform_2(%arg0: i32) -> (i32, i32) {
    %c0_i32 = arith.constant 0 : i32
    %c0_i32_0 = arith.constant 0 : i32
    return %c0_i32, %arg0 : i32, i32
  }
  func.func @transform_3(%arg0: i32) -> (i32, i32, i32) {
    %c0_i32 = arith.constant 0 : i32
    %c0_i32_0 = arith.constant 0 : i32
    %c0_i32_1 = arith.constant 0 : i32
    return %arg0, %c0_i32, %c0_i32_0 : i32, i32, i32
  }
}

</mosaic_0001>

<bundles_post_ra>
// kernel: tpu_custom_call.1
= control target key start
LH: loop header
LB: loop body
LE: loop exit
PB: predicated region body
PF: predicated region fallthrough
CT: control target
= control target key end

     0   :  { %9 = vsyncpa [#allocation3], 0  ;;  %s328_s0 = inlined_call_operand.hbm [shape: f32[8,32], index: 0, kind: input, shape index: {}]   ;;  %s329_s1 = inlined_call_operand.hbm [shape: bf16[8,24], index: 1, kind: input, shape index: {}]   ;;  %s330_s2 = inlined_call_operand.hbm [shape: bf16[8,32], index: 2, kind: output, shape index: {0}]   ;;  %s331_s3 = inlined_call_operand.vmem [shape: f32[1,8,2], index: 3, kind: output, shape index: {1}]  }
   0x1   :  { %10 = vsyncpa [#allocation6], 0 }
   0x2   :  { %11 = vsyncpa [#allocation4], 0  ;;  %s260_s12 = smov [#allocation2]   ;;  %s261_s14 = smov [#allocation5]  }
   0x3   :  { %s18_s13 = sshll.u32 %s260_s12, 4  ;;  %s28_s15 = sshll.u32 %s261_s14, 4  ;;  %s19_s13 = int_to_ptr.vmem [resolvable:$true] %s18_s13  ;;  %s29_s15 = int_to_ptr.vmem [resolvable:$true] %s28_s15 }
   0x4   :  { %s188_s18 = scalar_lea.hbm %s328_s0, 128 }
   0x5   :  { %p189_p0 = scmp.ne.s32.totalorder %s328_s0, %s188_s18  ;;  %p192_p1 = scmp.lt.u32.totalorder %s188_s18, %s328_s0 }
   0x7   :  { %p194_p2 = pnand %p192_p1, %p189_p0 }
   0x9   :  { %197 = shalt.err (!%p194_p2)
}
   0xa   :  { %s198_s23 = scalar_lea.vmem %s19_s13, 128  ;;  %p203_p4 = scmp.lt.s32.totalorder %s19_s13, %s19_s13 }
   0xb   :  { %p199_p3 = scmp.ne.s32.totalorder %s19_s13, %s198_s23  ;;  %p204_p5 = scmp.lt.s32.totalorder %s198_s23, %s198_s23 }
   0xd   :  { %p205_p6 = por %p204_p5, %p203_p4 }
   0xf   :  { %p206_p7 = pnand %p205_p6, %p199_p3 }
  0x11   :  { %209 = shalt.err (!%p206_p7)
}
  0x12   :  { %21 = dma.hbm_to_vmem [thread:$0]  %s328_s0, 128, %s19_s13, [#allocation3]  }
  0x13   :  { %s210_s28 = scalar_lea.hbm %s329_s1, 64 }
  0x14   :  { %p211_p8 = scmp.ne.s32.totalorder %s329_s1, %s210_s28  ;;  %p214_p9 = scmp.lt.u32.totalorder %s210_s28, %s329_s1 }
  0x16   :  { %p216_p10 = pnand %p214_p9, %p211_p8 }
  0x18   :  { %219 = shalt.err (!%p216_p10)
}
  0x19   :  { %s220_s6 = scalar_lea.vmem %s29_s15, 64  ;;  %p225_p12 = scmp.lt.s32.totalorder %s29_s15, %s29_s15 }
  0x1a   :  { %p221_p11 = scmp.ne.s32.totalorder %s29_s15, %s220_s6  ;;  %p226_p13 = scmp.lt.s32.totalorder %s220_s6, %s220_s6 }
  0x1c   :  { %p227_p0 = por %p226_p13, %p225_p12 }
  0x1e   :  { %p228_p1 = pnand %p227_p0, %p221_p11 }
  0x20   :  { %231 = shalt.err (!%p228_p1)
}
  0x21   :  { %31 = dma.hbm_to_vmem [thread:$0]  %s329_s1, 64, %s29_s15, [#allocation6]  }
  0x22   :  { %254 = dma.done.wait [#allocation3], 128  }
  0x23   :  { %255 = vsyncadd [#allocation3], 4294967168 }
  0x24   :  { %256 = dma.done.wait [#allocation6], 64  }
  0x25   :  { %257 = vsyncadd [#allocation6], 4294967232  ;;  %v39_v0 = vld [vmem:[#allocation2] sm:$0xff]  ;;  %s262_s8 = smov 32   ;;  %vm54_vm0 = vcmask 1047808   ;;  %v263_v3 = vmov 0.0   ;;  %v40_v6 = vlaneseq }
  0x26   :  { %55 = vrot.lane.b32.xlu0 %v39_v0, %s262_s8  ;;  %171 = vmatprep.subr.bf16.mxu0 %v263_v3  ;;  %vm264_vm1 = vmmov 0   ;;  %s265_s9 = smov 98   ;;  %s266_s1 = smov 126   ;;  %vm267_vm3 = vmmov 1   ;;  %vm83_vm6 = vcmask 1043456   ;;  %vm79_vm7 = vcmask 195584  }
  0x27   :  { %175 = vmatprep.mubr.msk.bf16.mxu0 %vm264_vm1, %v263_v3  ;;  %v41_v7 = vand.u32 127, %v40_v6  ;;  %v78_v15 = vld [vmem:[#allocation5] sm:$0xf]  ;;  %vm130_vm8 = vcmask 261120   ;;  %vm128_vm9 = vcmask 257024   ;;  %s268_s10 = smov [#allocation7]  }
  0x28   :  { %s150_s11 = sshll.u32 %s268_s10, 4  ;;  %s151_s11 = int_to_ptr.vmem [resolvable:$true] %s150_s11 }
  0x29   :  { %v46_v8 = vand.u32 15, %v41_v7  ;;  %s232_s12 = scalar_lea.vmem %s151_s11, 64  ;;  %p237_p3 = scmp.lt.s32.totalorder %s151_s11, %s151_s11 }
  0x2a   :  { %p233_p2 = scmp.ne.s32.totalorder %s151_s11, %s232_s12  ;;  %p238_p4 = scmp.lt.s32.totalorder %s232_s12, %s232_s12 }
  0x2b   :  { %vm61_vm2 = vcmp.ge.s32.totalorder %v46_v8, 2  ;;  %vm70_vm5 = vcmp.lt.s32.totalorder %v46_v8, 14 }
  0x2c   :  { %vm164_vm4 = vmpackc.low %vm267_vm3, %vm61_vm2  ;;  %p239_p5 = por %p238_p4, %p237_p3 }
  0x2e   :  { %p240_p6 = pnand %p239_p5, %p233_p2 }
  0x98   :  { %v56_v1 = vpop.permute.xlu0 %55 }
  0x99   :  { %v57_v2 = vsel %vm54_vm0, %v56_v1, %v39_v0 }
  0x9a   :  { %58 = vrot.lane.b32.xlu0 %v57_v2, %s262_s8 }
 0x10c   :  { %v59_v4 = vpop.permute.xlu0 %58 }
 0x10d   :  { %v60_v5 = vsel %vm54_vm0, %v59_v4, %v39_v0 }
 0x10e   :  { %65 = vrot.lane.b32.xlu1 %v60_v5, %s265_s9 }
 0x112   :  { %72 = vrot.lane.b32.xlu1 %v60_v5, %s266_s1 }
 0x180   :  { %v66_v9 = vpop.permute.xlu1 %65 }
 0x181   :  { %v165_v10 = vpack.c.bf16 %v39_v0, %v66_v9 }
 0x183   :  { %172 = vmatpush3.bf16.msk.msra.mxu0 %vm164_vm4, %v165_v10 }
 0x184   :  { %v73_v11 = vpop.permute.xlu1 %72  ;;  %173 = vmatprep.subr.bf16.mxu0 %v263_v3 }
 0x185   :  { %v75_v12 = vsel %vm70_vm5, %v73_v11, 0.0 }
 0x186   :  { %v77_v13 = vpack.c.bf16 %v75_v12, %v75_v12 }
 0x188   :  { %v85_v14 = vsel %vm83_vm6, %v77_v13, 0 }
 0x189   :  { %174 = vmatpush3.bf16.msra.mxu0 %v85_v14 }
 0x18c   :  { %176 = vmatmul.mubr.msk.bf16.vlgmr.msra.gmra.mrb[0].mxu0 %vm79_vm7, %v78_v15 }
 0x25f   :  { %v121_v16 = vpop.f32.mrb[0].mxu0 }
 0x260   :  { %v127_v17 = vpack.c.bf16 %v121_v16, %v121_v16  ;;  %v177_v18 = vpop.f32.mrb[1].mxu0  ;;  %v131_v19 = vsel %vm130_vm8, %v121_v16, 0.0 }
 0x261   :  { %132 = vadd.xlane.f32.xlu0 %v131_v19  ;;  %v124_v20 = vpop.f32.mrb[2].mxu0 }
 0x262   :  { %v178_v21 = vpop.f32.mrb[3].mxu0  ;;  %129 = vst.msk [vmem:[#allocation7] sm:$0xf] %vm128_vm9, %v127_v17 }
 0x2ee   :  { %v133_v22 = vpop.xlane.xlu0 %132 }
 0x2ef   :  { %v134_v23 = vmul.f32 0.03125, %v133_v22 }
 0x2f1   :  { %v135_v24 = vsub.f32 %v121_v16, %v134_v23 }
 0x2f3   :  { %v136_v25 = vmul.f32 %v135_v24, %v135_v24 }
 0x2f5   :  { %v137_v26 = vsel %vm130_vm8, %v136_v25, 0.0 }
 0x2f6   :  { %138 = vadd.xlane.f32.xlu1 %v137_v26 }
 0x2f7   :  { %243 = shalt.err (!%p240_p6)
}
 0x2f8   :  { %s244_s15 = scalar_lea.hbm %s330_s2, 64 }
 0x2f9   :  { %p245_p7 = scmp.ne.s32.totalorder %s330_s2, %s244_s15  ;;  %p248_p8 = scmp.lt.u32.totalorder %s244_s15, %s330_s2 }
 0x2fb   :  { %p250_p9 = pnand %p248_p8, %p245_p7 }
 0x2fd   :  { %253 = shalt.err (!%p250_p9)
}
 0x2fe   :  { %153 = dma.vmem_to_hbm [thread:$0]  %s151_s11, 64, %s330_s2, [#allocation4]   ;;  %vm140_vm10 = vcmask 7168   ;;  %vm142_vm11 = vcmask 15360  }
 0x383   :  { %v139_v27 = vpop.xlane.xlu1 %138 }
 0x384   :  { %v141_v28 = vsel %vm140_vm10, %v133_v22, %v139_v27 }
 0x385   :  { %143 = vst.msk [vmem:[%s331_s3] sm:$0xff] %vm142_vm11, %v141_v28 }
 0x386   :  { %258 = dma.done.wait [#allocation4], 64  }
 0x387   :  { %259 = vsyncadd [#allocation4], 4294967232 }
 0x388   :  { %161 = vsyncpa [#allocation3], 1 }
 0x389   :  { %162 = vsyncpa [#allocation6], 1 }
 0x38a   :  { %163 = vsyncpa [#allocation4], 1 }

</bundles_post_ra>
